<compile_context>
chip_gen: v7x
topology: tpu7x:2x2x1
jax: 0.10.0
libtpu: 0.0.40
codegen_flags: <defaults>
</compile_context>

<pallas_src>
import jax
import jax.numpy as jnp
from jax.experimental import pallas as pl
from jax.experimental.pallas import tpu as pltpu


def _leaky_relu(x, negative_slope=0.01):
    # PyTorch nn.LeakyReLU default negative_slope = 0.01
    return jnp.where(x > 0, x, negative_slope * x)


def _round_up(x, m):
    return (x + m - 1) // m * m


def _generator_kernel(rand_ref, emb_ref,
                      w1r_ref, w1e_ref, b1_ref,
                      w2_ref, b2_ref,
                      w3_ref, b3_ref,
                      w4_ref, b4_ref,
                      o_ref):
    """Fused 4-layer MLP + residual add on one (tm, *) row tile.

    rand_ref : (tm, 100)   noise rows
    emb_ref  : (tm, Dp)    embedding rows, lanes >= D are zero
    w1r_ref  : (100, H1)   first-layer weight block acting on the noise
    w1e_ref  : (Dp,  H1)   first-layer weight block acting on the embedding
    w2/w3    : hidden-layer weights, w4_ref: (H1, Dp) zero-padded columns
    bK_ref   : (1, outK)   biases (b4 zero-padded to Dp)
    o_ref    : (tm, Dp)    lane-dense output tile
    """
    f32 = jnp.float32
    emb = emb_ref[...].astype(f32)

    h = (jnp.dot(rand_ref[...], w1r_ref[...], preferred_element_type=f32)
         + jnp.dot(emb, w1e_ref[...], preferred_element_type=f32)
         + b1_ref[...])
    h = _leaky_relu(h)
    # TODO(synk): Dropout(0.2) omitted (eval-mode identity).
    h = jnp.dot(h, w2_ref[...], preferred_element_type=f32) + b2_ref[...]
    h = _leaky_relu(h)
    h = jnp.dot(h, w3_ref[...], preferred_element_type=f32) + b3_ref[...]
    h = _leaky_relu(h)
    h = jnp.dot(h, w4_ref[...], preferred_element_type=f32) + b4_ref[...]
    # Residual: padded lanes are zero in both h and emb, so they stay zero.
    o_ref[...] = (h + emb).astype(o_ref.dtype)


def generator_pallas(rand, emb, params, *, tm=512):
    """rand: (N, 100) noise, emb: (N, D) embedding output -> (N, D)."""
    (w1, b1), (w2, b2), (w3, b3), (w4, b4) = params
    N, R = rand.shape
    D = emb.shape[1]
    dtype = emb.dtype

    # Lane-dense feature padding (D -> multiple of 128) for loads/stores.
    Dp = _round_up(D, 128)
    # Row tiling: big tiles, clamped for tiny inputs; rows padded to a multiple
    # of the tile so the grid divides evenly.
    tm_eff = min(tm, _round_up(N, 8))
    Np = _round_up(N, tm_eff)

    # Split W1 into noise / embedding halves (concat order was [rand, emb]);
    # zero-pad the embedding half and the final projection so the padded lanes
    # contribute / receive exactly zero.
    w1r = w1[:R]
    w1e = jnp.pad(w1[R:], ((0, Dp - D), (0, 0)))
    w4p = jnp.pad(w4, ((0, 0), (0, Dp - D)))
    b4p = jnp.pad(b4, ((0, 0), (0, Dp - D)))

    rand_p = jnp.pad(rand, ((0, Np - N), (0, 0)))
    emb_p = jnp.pad(emb, ((0, Np - N), (0, Dp - D)))

    grid = (Np // tm_eff,)
    full = lambda a: pl.BlockSpec(a.shape, lambda i: (0, 0))     # grid-invariant
    row = lambda w: pl.BlockSpec((tm_eff, w), lambda i: (i, 0))  # row tiles

    flops = 2 * Np * (R * w1r.shape[1] + Dp * w1e.shape[1]
                      + w2.shape[0] * w2.shape[1]
                      + w3.shape[0] * w3.shape[1]
                      + w4p.shape[0] * w4p.shape[1])
    bytes_accessed = 4 * (Np * R + 2 * Np * Dp) + sum(
        4 * a.size for a in (w1r, w1e, b1, w2, b2, w3, b3, w4p, b4p))

    out = pl.pallas_call(
        _generator_kernel,
        out_shape=jax.ShapeDtypeStruct((Np, Dp), dtype),
        grid_spec=pl.GridSpec(
            grid=grid,
            in_specs=[
                row(R),            # noise rows
                row(Dp),           # embedding rows (also residual)
                full(w1r), full(w1e), full(b1),
                full(w2), full(b2),
                full(w3), full(b3),
                full(w4p), full(b4p),
            ],
            out_specs=row(Dp),
        ),
        compiler_params=pltpu.CompilerParams(
            dimension_semantics=("parallel",)),
        cost_estimate=pl.CostEstimate(
            flops=int(flops), transcendentals=0,
            bytes_accessed=int(bytes_accessed)),
    )(rand_p, emb_p, w1r, w1e, b1, w2, b2, w3, b3, w4p, b4p)

    return out[:N, :D]


def init_params(key, embedding_dim, dtype=jnp.float32):
    """Deterministic init matching the module's layer shapes.

    generator_layer_size = embedding_dim + 100
    layer1: gen      -> gen//2
    layer2: gen//2   -> gen//4
    layer3: gen//4   -> gen//2
    layer4: gen//2   -> embedding_dim
    Weights are stored as (in_features, out_features) for in-kernel x @ W.
    """
    gen = embedding_dim + 100
    dims = [(gen, gen // 2), (gen // 2, gen // 4),
            (gen // 4, gen // 2), (gen // 2, gen - 100)]
    params = []
    for fin, fout in dims:
        kw, kb, key = jax.random.split(key, 3)
        bound = 1.0 / jnp.sqrt(fin)
        w = jax.random.uniform(kw, (fin, fout), dtype, -bound, bound)
        b = jax.random.uniform(kb, (1, fout), dtype, -bound, bound)
        params.append((w, b))
    return params, key


@jax.jit
def embedding_generator_forward(tokens, emb_table, w1, b1, w2, b2, w3, b3,
                                w4, b4, noise_key):
    """Equivalent of EmbeddingGenerator.forward (eval mode)."""
    B, S = tokens.shape
    D = emb_table.shape[1]
    dtype = emb_table.dtype

    emb = jnp.take(emb_table, tokens, axis=0)                 # (B, S, D)
    # TODO(synk): noise could be generated in-kernel via pltpu.prng_seed /
    # pltpu.stateful_normal to save one HBM stream; kept external here so the
    # forward stays exactly reproducible against the pure-JAX reference.
    rand = jax.random.normal(noise_key, (B, S, 100), dtype)   # torch.randn analogue

    N = B * S
    out_flat = generator_pallas(
        rand.reshape(N, 100),
        emb.reshape(N, D),
        ((w1, b1), (w2, b2), (w3, b3), (w4, b4)),
    )
    return out_flat.reshape(B, S, D)


def reference_forward(tokens, emb_table, params, noise_key):
    """Pure-JAX reference (mirrors the PyTorch module, eval mode)."""
    (w1, b1), (w2, b2), (w3, b3), (w4, b4) = params
    B, S = tokens.shape
    emb = jnp.take(emb_table, tokens, axis=0)
    rand = jax.random.normal(noise_key, (B, S, 100), emb_table.dtype)
    x = jnp.concatenate([rand, emb], axis=-1)
    h = _leaky_relu(x @ w1 + b1)
    h = _leaky_relu(h @ w2 + b2)
    h = _leaky_relu(h @ w3 + b3)
    h = h @ w4 + b4
    return h + emb


if __name__ == "__main__":
    key = jax.random.PRNGKey(0)

    # Small, module-consistent shapes:
    #   embedding_dim D = 28 -> generator_layer_size = 128 -> 64 -> 32 -> 64 -> 28
    VOCAB, D = 64, 28
    B, S = 2, 8

    k_emb, k_tok, k_noise, key = jax.random.split(key, 4)
    emb_table = jax.random.normal(k_emb, (VOCAB, D), jnp.float32)
    tokens = jax.random.randint(k_tok, (B, S), 0, VOCAB, jnp.int32)
    params, key = init_params(key, D, jnp.float32)
    (w1, b1), (w2, b2), (w3, b3), (w4, b4) = params

    out = embedding_generator_forward(
        tokens, emb_table, w1, b1, w2, b2, w3, b3, w4, b4, k_noise)
    out = jax.block_until_ready(out)

    ref = reference_forward(tokens, emb_table, params, k_noise)
    assert out.shape == (B, S, D)
    assert jnp.allclose(out, ref, atol=1e-4, rtol=1e-4)

    print("KERNEL_OK")
</pallas_src>

<mosaic_0001>
module attributes {stable_mosaic.version = 11 : i64} {
  func.func @_generator_kernel(%arg0: i32, %arg1: memref<16x100xf32, #tpu.memory_space<vmem>>, %arg2: memref<16x128xf32, #tpu.memory_space<vmem>>, %arg3: memref<100x64xf32, #tpu.memory_space<vmem>>, %arg4: memref<128x64xf32, #tpu.memory_space<vmem>>, %arg5: memref<1x64xf32, #tpu.memory_space<vmem>>, %arg6: memref<64x32xf32, #tpu.memory_space<vmem>>, %arg7: memref<1x32xf32, #tpu.memory_space<vmem>>, %arg8: memref<32x64xf32, #tpu.memory_space<vmem>>, %arg9: memref<1x64xf32, #tpu.memory_space<vmem>>, %arg10: memref<64x128xf32, #tpu.memory_space<vmem>>, %arg11: memref<1x128xf32, #tpu.memory_space<vmem>>, %arg12: memref<16x128xf32, #tpu.memory_space<vmem>>) attributes {dimension_semantics = [#tpu.dimension_semantics<parallel>], iteration_bounds = array<i64: 1>, scalar_prefetch = 0 : i64, scratch_operands = 0 : i64, tpu.core_type = #tpu.core_type<tc>, window_params = [{transform_indices = @transform_0, window_bounds = array<i64: 16, 100>}, {transform_indices = @transform_1, window_bounds = array<i64: 16, 128>}, {pipeline_mode = #tpu.pipeline_mode<synchronous>, transform_indices = @transform_2, window_bounds = array<i64: 100, 64>}, {pipeline_mode = #tpu.pipeline_mode<synchronous>, transform_indices = @transform_3, window_bounds = array<i64: 128, 64>}, {pipeline_mode = #tpu.pipeline_mode<synchronous>, transform_indices = @transform_4, window_bounds = array<i64: 1, 64>}, {pipeline_mode = #tpu.pipeline_mode<synchronous>, transform_indices = @transform_5, window_bounds = array<i64: 64, 32>}, {pipeline_mode = #tpu.pipeline_mode<synchronous>, transform_indices = @transform_6, window_bounds = array<i64: 1, 32>}, {pipeline_mode = #tpu.pipeline_mode<synchronous>, transform_indices = @transform_7, window_bounds = array<i64: 32, 64>}, {pipeline_mode = #tpu.pipeline_mode<synchronous>, transform_indices = @transform_8, window_bounds = array<i64: 1, 64>}, {pipeline_mode = #tpu.pipeline_mode<synchronous>, transform_indices = @transform_9, window_bounds = array<i64: 64, 128>}, {pipeline_mode = #tpu.pipeline_mode<synchronous>, transform_indices = @transform_10, window_bounds = array<i64: 1, 128>}, {transform_indices = @transform_11, window_bounds = array<i64: 16, 128>}]} {
    %c0 = arith.constant 0 : index
    %c0_0 = arith.constant 0 : index
    %0 = vector.load %arg2[%c0, %c0_0] : memref<16x128xf32, #tpu.memory_space<vmem>>, vector<16x128xf32>
    %c0_1 = arith.constant 0 : index
    %c0_2 = arith.constant 0 : index
    %1 = vector.load %arg1[%c0_1, %c0_2] : memref<16x100xf32, #tpu.memory_space<vmem>>, vector<16x100xf32>
    %c0_3 = arith.constant 0 : index
    %c0_4 = arith.constant 0 : index
    %2 = vector.load %arg3[%c0_3, %c0_4] : memref<100x64xf32, #tpu.memory_space<vmem>>, vector<100x64xf32>
    %cst = arith.constant dense<0.000000e+00> : vector<16x64xf32>
    %3 = tpu.matmul %1, %2, %cst {dimension_numbers = #tpu.dot_dimension_numbers<[1], [0], [0], [1], [0, 0, 1, 1], [], []>} : vector<16x100xf32>, vector<100x64xf32>, vector<16x64xf32> -> vector<16x64xf32>
    %c0_5 = arith.constant 0 : index
    %c0_6 = arith.constant 0 : index
    %4 = vector.load %arg4[%c0_5, %c0_6] : memref<128x64xf32, #tpu.memory_space<vmem>>, vector<128x64xf32>
    %cst_7 = arith.constant dense<0.000000e+00> : vector<16x64xf32>
    %5 = tpu.matmul %0, %4, %cst_7 {dimension_numbers = #tpu.dot_dimension_numbers<[1], [0], [0], [1], [0, 0, 1, 1], [], []>} : vector<16x128xf32>, vector<128x64xf32>, vector<16x64xf32> -> vector<16x64xf32>
    %6 = arith.addf %3, %5 : vector<16x64xf32>
    %c0_8 = arith.constant 0 : index
    %c0_9 = arith.constant 0 : index
    %7 = vector.load %arg5[%c0_8, %c0_9] : memref<1x64xf32, #tpu.memory_space<vmem>>, vector<1x64xf32>
    %8 = vector.broadcast %7 : vector<1x64xf32> to vector<16x64xf32>
    %9 = arith.addf %6, %8 : vector<16x64xf32>
    %cst_10 = arith.constant 0.000000e+00 : f32
    %10 = vector.broadcast %cst_10 : f32 to vector<16x64xf32>
    %11 = arith.cmpf ogt, %9, %10 : vector<16x64xf32>
    %cst_11 = arith.constant 0.00999999977 : f32
    %12 = vector.broadcast %cst_11 : f32 to vector<16x64xf32>
    %13 = arith.mulf %12, %9 : vector<16x64xf32>
    %14 = arith.select %11, %9, %13 : vector<16x64xi1>, vector<16x64xf32>
    %c0_12 = arith.constant 0 : index
    %c0_13 = arith.constant 0 : index
    %15 = vector.load %arg6[%c0_12, %c0_13] : memref<64x32xf32, #tpu.memory_space<vmem>>, vector<64x32xf32>
    %cst_14 = arith.constant dense<0.000000e+00> : vector<16x32xf32>
    %16 = tpu.matmul %14, %15, %cst_14 {dimension_numbers = #tpu.dot_dimension_numbers<[1], [0], [0], [1], [0, 0, 1, 1], [], []>} : vector<16x64xf32>, vector<64x32xf32>, vector<16x32xf32> -> vector<16x32xf32>
    %c0_15 = arith.constant 0 : index
    %c0_16 = arith.constant 0 : index
    %17 = vector.load %arg7[%c0_15, %c0_16] : memref<1x32xf32, #tpu.memory_space<vmem>>, vector<1x32xf32>
    %18 = vector.broadcast %17 : vector<1x32xf32> to vector<16x32xf32>
    %19 = arith.addf %16, %18 : vector<16x32xf32>
    %cst_17 = arith.constant 0.000000e+00 : f32
    %20 = vector.broadcast %cst_17 : f32 to vector<16x32xf32>
    %21 = arith.cmpf ogt, %19, %20 : vector<16x32xf32>
    %cst_18 = arith.constant 0.00999999977 : f32
    %22 = vector.broadcast %cst_18 : f32 to vector<16x32xf32>
    %23 = arith.mulf %22, %19 : vector<16x32xf32>
    %24 = arith.select %21, %19, %23 : vector<16x32xi1>, vector<16x32xf32>
    %c0_19 = arith.constant 0 : index
    %c0_20 = arith.constant 0 : index
    %25 = vector.load %arg8[%c0_19, %c0_20] : memref<32x64xf32, #tpu.memory_space<vmem>>, vector<32x64xf32>
    %cst_21 = arith.constant dense<0.000000e+00> : vector<16x64xf32>
    %26 = tpu.matmul %24, %25, %cst_21 {dimension_numbers = #tpu.dot_dimension_numbers<[1], [0], [0], [1], [0, 0, 1, 1], [], []>} : vector<16x32xf32>, vector<32x64xf32>, vector<16x64xf32> -> vector<16x64xf32>
    %c0_22 = arith.constant 0 : index
    %c0_23 = arith.constant 0 : index
    %27 = vector.load %arg9[%c0_22, %c0_23] : memref<1x64xf32, #tpu.memory_space<vmem>>, vector<1x64xf32>
    %28 = vector.broadcast %27 : vector<1x64xf32> to vector<16x64xf32>
    %29 = arith.addf %26, %28 : vector<16x64xf32>
    %cst_24 = arith.constant 0.000000e+00 : f32
    %30 = vector.broadcast %cst_24 : f32 to vector<16x64xf32>
    %31 = arith.cmpf ogt, %29, %30 : vector<16x64xf32>
    %cst_25 = arith.constant 0.00999999977 : f32
    %32 = vector.broadcast %cst_25 : f32 to vector<16x64xf32>
    %33 = arith.mulf %32, %29 : vector<16x64xf32>
    %34 = arith.select %31, %29, %33 : vector<16x64xi1>, vector<16x64xf32>
    %c0_26 = arith.constant 0 : index
    %c0_27 = arith.constant 0 : index
    %35 = vector.load %arg10[%c0_26, %c0_27] : memref<64x128xf32, #tpu.memory_space<vmem>>, vector<64x128xf32>
    %cst_28 = arith.constant dense<0.000000e+00> : vector<16x128xf32>
    %36 = tpu.matmul %34, %35, %cst_28 {dimension_numbers = #tpu.dot_dimension_numbers<[1], [0], [0], [1], [0, 0, 1, 1], [], []>} : vector<16x64xf32>, vector<64x128xf32>, vector<16x128xf32> -> vector<16x128xf32>
    %c0_29 = arith.constant 0 : index
    %c0_30 = arith.constant 0 : index
    %37 = vector.load %arg11[%c0_29, %c0_30] : memref<1x128xf32, #tpu.memory_space<vmem>>, vector<1x128xf32>
    %38 = vector.broadcast %37 : vector<1x128xf32> to vector<16x128xf32>
    %39 = arith.addf %36, %38 : vector<16x128xf32>
    %40 = arith.addf %39, %0 : vector<16x128xf32>
    %c0_31 = arith.constant 0 : index
    %c0_32 = arith.constant 0 : index
    %41 = vector.load %arg12[%c0_31, %c0_32] : memref<16x128xf32, #tpu.memory_space<vmem>>, vector<16x128xf32>
    tpu.vector_store %arg12[%c0_31, %c0_32], %40 {strides = array<i32>} : memref<16x128xf32, #tpu.memory_space<vmem>>, vector<16x128xf32>,
    return
  }
  func.func @transform_0(%arg0: i32) -> (i32, i32) {
    %c0_i32 = arith.constant 0 : i32
    %c0_i32_0 = arith.constant 0 : i32
    return %arg0, %c0_i32 : i32, i32
  }
  func.func @transform_1(%arg0: i32) -> (i32, i32) {
    %c0_i32 = arith.constant 0 : i32
    %c0_i32_0 = arith.constant 0 : i32
    return %arg0, %c0_i32 : i32, i32
  }
  func.func @transform_2(%arg0: i32) -> (i32, i32) {
    %c0_i32 = arith.constant 0 : i32
    %c0_i32_0 = arith.constant 0 : i32
    %c0_i32_1 = arith.constant 0 : i32
    return %c0_i32, %c0_i32_0 : i32, i32
  }
  func.func @transform_3(%arg0: i32) -> (i32, i32) {
    %c0_i32 = arith.constant 0 : i32
    %c0_i32_0 = arith.constant 0 : i32
    %c0_i32_1 = arith.constant 0 : i32
    return %c0_i32, %c0_i32_0 : i32, i32
  }
  func.func @transform_4(%arg0: i32) -> (i32, i32) {
    %c0_i32 = arith.constant 0 : i32
    %c0_i32_0 = arith.constant 0 : i32
    %c0_i32_1 = arith.constant 0 : i32
    return %c0_i32, %c0_i32_0 : i32, i32
  }
  func.func @transform_5(%arg0: i32) -> (i32, i32) {
    %c0_i32 = arith.constant 0 : i32
    %c0_i32_0 = arith.constant 0 : i32
    %c0_i32_1 = arith.constant 0 : i32
    return %c0_i32, %c0_i32_0 : i32, i32
  }
  func.func @transform_6(%arg0: i32) -> (i32, i32) {
    %c0_i32 = arith.constant 0 : i32
    %c0_i32_0 = arith.constant 0 : i32
    %c0_i32_1 = arith.constant 0 : i32
    return %c0_i32, %c0_i32_0 : i32, i32
  }
  func.func @transform_7(%arg0: i32) -> (i32, i32) {
    %c0_i32 = arith.constant 0 : i32
    %c0_i32_0 = arith.constant 0 : i32
    %c0_i32_1 = arith.constant 0 : i32
    return %c0_i32, %c0_i32_0 : i32, i32
  }
  func.func @transform_8(%arg0: i32) -> (i32, i32) {
    %c0_i32 = arith.constant 0 : i32
    %c0_i32_0 = arith.constant 0 : i32
    %c0_i32_1 = arith.constant 0 : i32
    return %c0_i32, %c0_i32_0 : i32, i32
  }
  func.func @transform_9(%arg0: i32) -> (i32, i32) {
    %c0_i32 = arith.constant 0 : i32
    %c0_i32_0 = arith.constant 0 : i32
    %c0_i32_1 = arith.constant 0 : i32
    return %c0_i32, %c0_i32_0 : i32, i32
  }
  func.func @transform_10(%arg0: i32) -> (i32, i32) {
    %c0_i32 = arith.constant 0 : i32
    %c0_i32_0 = arith.constant 0 : i32
    %c0_i32_1 = arith.constant 0 : i32
    return %c0_i32, %c0_i32_0 : i32, i32
  }
  func.func @transform_11(%arg0: i32) -> (i32, i32) {
    %c0_i32 = arith.constant 0 : i32
    %c0_i32_0 = arith.constant 0 : i32
    return %arg0, %c0_i32 : i32, i32
  }
}

</mosaic_0001>

<bundles_post_ra>
// kernel: embedding_generator_forward.1
= control target key start
LH: loop header
LB: loop body
LE: loop exit
PB: predicated region body
PF: predicated region fallthrough
CT: control target
= control target key end

     0   :  { %vm146_vm0 = vcmask 818176   ;;  %vm153_vm1 = vcmask 1043456   ;;  %vm262_vm4 = vcmask 523264   ;;  %vm361_vm7 = vcmask 261120   ;;  %s1087_s3 = inlined_call_operand.vmem [shape: f32[128,64], index: 3, kind: input, shape index: {}]   ;;  %s1088_s1 = inlined_call_operand.vmem [shape: f32[16,128], index: 1, kind: input, shape index: {}]   ;;  %s1089_s5 = inlined_call_operand.vmem [shape: f32[64,32], index: 5, kind: input, shape index: {}]   ;;  %s1090_s2 = inlined_call_operand.vmem [shape: f32[100,64], index: 2, kind: input, shape index: {}]   ;;  %s1091_s0 = inlined_call_operand.vmem [shape: f32[16,100], index: 0, kind: input, shape index: {}]   ;;  %s1092_s4 = inlined_call_operand.vmem [shape: f32[1,64], index: 4, kind: input, shape index: {}]   ;;  %s1093_s7 = inlined_call_operand.vmem [shape: f32[32,64], index: 7, kind: input, shape index: {}]   ;;  %s1094_s9 = inlined_call_operand.vmem [shape: f32[64,128], index: 9, kind: input, shape index: {}]   ;;  %s1095_s6 = inlined_call_operand.vmem [shape: f32[1,32], index: 6, kind: input, shape index: {}]   ;;  %s1096_s8 = inlined_call_operand.vmem [shape: f32[1,64], index: 8, kind: input, shape index: {}]   ;;  %s1097_s10 = inlined_call_operand.vmem [shape: f32[1,128], index: 10, kind: input, shape index: {}]   ;;  %s1098_s11 = inlined_call_operand.vmem [shape: f32[16,128], index: 11, kind: output, shape index: {}]  }
   0x1   :  { %v55_v0 = vld [vmem:[%s1087_s3] sm:$0xff]  ;;  %v56_v1 = vld [vmem:[%s1087_s3 + $0x8] sm:$0xff]  ;;  %v57_v2 = vld [vmem:[%s1087_s3 + $0x10] sm:$0xff] }
   0x2   :  { %v738_v3 = vpack.c.bf16 %v56_v1, %v55_v0  ;;  %v58_v4 = vld [vmem:[%s1087_s3 + $0x18] sm:$0xff]  ;;  %v59_v6 = vld [vmem:[%s1087_s3 + $0x20] sm:$0xff]  ;;  %v60_v7 = vld [vmem:[%s1087_s3 + $0x28] sm:$0xff] }
   0x3   :  { %v742_v5 = vpack.c.bf16 %v58_v4, %v57_v2  ;;  %v746_v8 = vpack.c.bf16 %v60_v7, %v59_v6  ;;  %v917_v9 = vld [vmem:[%s1088_s1] sm:$0xff]  ;;  %v61_v10 = vld [vmem:[%s1087_s3 + $0x30] sm:$0xff]  ;;  %v62_v11 = vld [vmem:[%s1087_s3 + $0x38] sm:$0xff] }
   0x4   :  { %739 = vmatprep.subr.bf16.mxu0 %v738_v3  ;;  %657 = vmatprep.mubr.f32.mxu0 %v917_v9  ;;  %v750_v12 = vpack.c.bf16 %v62_v11, %v61_v10  ;;  %v63_v13 = vld [vmem:[%s1087_s3 + $0x40] sm:$0xff]  ;;  %v64_v14 = vld [vmem:[%s1087_s3 + $0x48] sm:$0xff]  ;;  %v249_v17 = vld [vmem:[%s1089_s5 + $0x10] sm:$0xff] }
   0x5   :  { %741 = vmatpush3.bf16.msra.mxu0 %v738_v3  ;;  %v247_v15 = vld [vmem:[%s1089_s5] sm:$0xff]  ;;  %v248_v16 = vld [vmem:[%s1089_s5 + $0x8] sm:$0xff]  ;;  %v250_v19 = vld [vmem:[%s1089_s5 + $0x18] sm:$0xff]  ;;  %v754_v20 = vpack.c.bf16 %v64_v14, %v63_v13 }
   0x6   :  { %743 = vmatprep.subr.bf16.mxu0 %v742_v5  ;;  %v794_v18 = vpack.c.bf16 %v248_v16, %v247_v15  ;;  %v798_v21 = vpack.c.bf16 %v250_v19, %v249_v17  ;;  %v65_v22 = vld [vmem:[%s1087_s3 + $0x50] sm:$0xff]  ;;  %v66_v23 = vld [vmem:[%s1087_s3 + $0x58] sm:$0xff]  ;;  %v67_v25 = vld [vmem:[%s1087_s3 + $0x60] sm:$0xff] }
   0x7   :  { %v758_v24 = vpack.c.bf16 %v66_v23, %v65_v22  ;;  %v68_v26 = vld [vmem:[%s1087_s3 + $0x68] sm:$0xff]  ;;  %v69_v28 = vld [vmem:[%s1087_s3 + $0x70] sm:$0xff]  ;;  %v70_v29 = vld [vmem:[%s1087_s3 + $0x78] sm:$0xff] }
   0x8   :  { %795 = vmatprep.subr.bf16.mxu1 %v794_v18  ;;  %v762_v27 = vpack.c.bf16 %v68_v26, %v67_v25  ;;  %v766_v30 = vpack.c.bf16 %v70_v29, %v69_v28  ;;  %v42_v31 = vld [vmem:[%s1090_s2] sm:$0xff]  ;;  %v43_v32 = vld [vmem:[%s1090_s2 + $0x8] sm:$0xff]  ;;  %v44_v34 = vld [vmem:[%s1090_s2 + $0x10] sm:$0xff] }
   0x9   :  { %745 = vmatpush3.bf16.msra.mxu0 %v742_v5  ;;  %797 = vmatpush3.bf16.msra.mxu1 %v794_v18  ;;  %v770_v33 = vpack.c.bf16 %v43_v32, %v42_v31  ;;  %v45_v35 = vld [vmem:[%s1090_s2 + $0x18] sm:$0xff]  ;;  %v977_v36 = vld [vmem:[%s1088_s1 + $0x8] sm:$0xff]  ;;  %v40_v38 = vld [vmem:[%s1091_s0] sm:$0xff] }
   0xa   :  { %747 = vmatprep.subr.bf16.mxu0 %v746_v8  ;;  %799 = vmatprep.subr.bf16.mxu1 %v798_v21  ;;  %v774_v37 = vpack.c.bf16 %v45_v35, %v44_v34  ;;  %v46_v39 = vld [vmem:[%s1090_s2 + $0x20] sm:$0xff]  ;;  %v47_v40 = vld [vmem:[%s1090_s2 + $0x28] sm:$0xff]  ;;  %v48_v42 = vld [vmem:[%s1090_s2 + $0x30] sm:$0xff] }
   0xb   :  { %v778_v41 = vpack.c.bf16 %v47_v40, %v46_v39  ;;  %v49_v43 = vld [vmem:[%s1090_s2 + $0x38] sm:$0xff]  ;;  %v50_v45 = vld [vmem:[%s1090_s2 + $0x40] sm:$0xff]  ;;  %v51_v46 = vld [vmem:[%s1090_s2 + $0x48] sm:$0xff] }
   0xc   :  { %v782_v44 = vpack.c.bf16 %v49_v43, %v48_v42  ;;  %v786_v47 = vpack.c.bf16 %v51_v46, %v50_v45  ;;  %v52_v48 = vld [vmem:[%s1090_s2 + $0x50] sm:$0xff]  ;;  %v53_v49 = vld [vmem:[%s1090_s2 + $0x58] sm:$0xff]  ;;  %v54_v51 = vld [vmem:[%s1090_s2 + $0x60] sm:$0xf] }
   0xd   :  { %749 = vmatpush3.bf16.msra.mxu0 %v746_v8  ;;  %801 = vmatpush3.bf16.msra.mxu1 %v798_v21  ;;  %v790_v50 = vpack.c.bf16 %v53_v49, %v52_v48  ;;  %v41_v52 = vld [vmem:[%s1091_s0 + $0x8] sm:$0xff]  ;;  %v251_v53 = vld [vmem:[%s1089_s5 + $0x20] sm:$0xff]  ;;  %v253_v56 = vld [vmem:[%s1089_s5 + $0x30] sm:$0xff] }
   0xe   :  { %751 = vmatprep.subr.bf16.mxu0 %v750_v12  ;;  %v252_v54 = vld [vmem:[%s1089_s5 + $0x28] sm:$0xff]  ;;  %v254_v57 = vld [vmem:[%s1089_s5 + $0x38] sm:$0xff]  ;;  %v556_v59 = vld [vmem:[%s1092_s4] ss:$0 sm:$0xff] }
   0xf   :  { %v802_v55 = vpack.c.bf16 %v252_v54, %v251_v53  ;;  %v806_v58 = vpack.c.bf16 %v254_v57, %v253_v56  ;;  %v350_v4 = vld [vmem:[%s1093_s7] sm:$0xff]  ;;  %v351_v5 = vld [vmem:[%s1093_s7 + $0x8] sm:$0xff]  ;;  %v352_v7 = vld [vmem:[%s1093_s7 + $0x10] sm:$0xff] }
  0x10   :  { %v810_v6 = vpack.c.bf16 %v351_v5, %v350_v4  ;;  %v353_v8 = vld [vmem:[%s1093_s7 + $0x18] sm:$0xff]  ;;  %v449_v11 = vld [vmem:[%s1094_s9] sm:$0xff]  ;;  %v455_v29 = vld [vmem:[%s1094_s9 + $0x30] sm:$0xff] }
  0x11   :  { %753 = vmatpush3.bf16.msra.mxu0 %v750_v12  ;;  %803 = vmatprep.subr.bf16.mxu1 %v802_v55  ;;  %v814_v10 = vpack.c.bf16 %v353_v8, %v352_v7  ;;  %v450_v12 = vld [vmem:[%s1094_s9 + $0x8] sm:$0xff]  ;;  %v557_v14 = vld [vmem:[%s1095_s6] ss:$0 sm:$0xff]  ;;  %v452_v21 = vld [vmem:[%s1094_s9 + $0x18] sm:$0xff] }
  0x12   :  { %755 = vmatprep.subr.bf16.mxu0 %v754_v20  ;;  %805 = vmatpush3.bf16.msra.mxu1 %v802_v55  ;;  %v818_v13 = vpack.c.bf16 %v450_v12, %v449_v11  ;;  %v453_v26 = vld [vmem:[%s1094_s9 + $0x20] sm:$0xff] }
  0x13   :  { %807 = vmatprep.subr.bf16.mxu1 %v806_v58  ;;  %v560_v32 = vld [vmem:[%s1096_s8] ss:$0 sm:$0xff] }
  0x14   :  { %v563_v42 = vld [vmem:[%s1097_s10] ss:$0 sm:$0xff] }
  0x15   :  { %757 = vmatpush3.bf16.msra.mxu0 %v754_v20  ;;  %v451_v20 = vld [vmem:[%s1094_s9 + $0x10] sm:$0xff] }
  0x16   :  { %759 = vmatprep.subr.bf16.mxu0 %v758_v24  ;;  %809 = vmatpush3.bf16.msra.mxu1 %v806_v58 }
  0x17   :  { %811 = vmatprep.subr.bf16.mxu1 %v810_v6 }
  0x19   :  { %761 = vmatpush3.bf16.msra.mxu0 %v758_v24  ;;  %v822_v24 = vpack.c.bf16 %v452_v21, %v451_v20 }
  0x1a   :  { %763 = vmatprep.subr.bf16.mxu0 %v762_v27 }
  0x1d   :  { %765 = vmatpush3.bf16.msra.mxu0 %v762_v27  ;;  %v454_v27 = vld [vmem:[%s1094_s9 + $0x28] sm:$0xff] }
  0x1e   :  { %767 = vmatprep.subr.bf16.mxu0 %v766_v30  ;;  %v826_v28 = vpack.c.bf16 %v454_v27, %v453_v26 }
  0x21   :  { %769 = vmatpush3.bf16.msra.mxu0 %v766_v30  ;;  %v456_v30 = vld [vmem:[%s1094_s9 + $0x38] sm:$0xff] }
  0x22   :  { %771 = vmatprep.subr.bf16.mxu0 %v770_v33  ;;  %v830_v31 = vpack.c.bf16 %v456_v30, %v455_v29 }
  0x24   :  { %658 = vmatmul.mubr.f32.vlgmr.msra.gmra.mrb[0].mxu0 %v977_v36 }
  0x25   :  { %773 = vmatpush3.bf16.msra.mxu0 %v770_v33  ;;  %686 = vmatprep.mubr.msk.f32.mxu0 %vm146_vm0, %v40_v38 }
  0x26   :  { %775 = vmatprep.subr.bf16.mxu0 %v774_v37 }
  0x29   :  { %777 = vmatpush3.bf16.msra.mxu0 %v774_v37 }
  0x2a   :  { %779 = vmatprep.subr.bf16.mxu0 %v778_v41 }
  0x2d   :  { %781 = vmatpush3.bf16.msra.mxu0 %v778_v41 }
  0x2e   :  { %783 = vmatprep.subr.bf16.mxu0 %v782_v44 }
  0x31   :  { %785 = vmatpush3.bf16.msra.mxu0 %v782_v44 }
  0x32   :  { %787 = vmatprep.subr.bf16.mxu0 %v786_v47 }
  0x35   :  { %789 = vmatpush3.bf16.msra.mxu0 %v786_v47 }
  0x36   :  { %791 = vmatprep.subr.bf16.mxu0 %v790_v50 }
  0x39   :  { %793 = vmatpush3.bf16.msra.mxu0 %v790_v50 }
  0x3a   :  { %684 = vmatprep.subr.msk.mxu0 %vm153_vm1, %v54_v51 }
  0x3d   :  { %685 = vmatpush3.msk.msra.mxu0 %vm153_vm1, %v54_v51 }
  0x3e   :  { %687 = vmatmul.mubr.msk.f32.vlgmr.msra.gmra.mrb[0].mxu0 %vm146_vm0, %v41_v52 }
 0x111   :  { %v688_v60 = vpop.f32.mrb[0].mxu0 }
 0x112   :  { %v240_v61 = vadd.f32 %v688_v60, %v556_v59  ;;  %v223_v62 = vpop.f32.mrb[1].mxu0 }
 0x113   :  { %v239_v63 = vadd.f32 %v556_v59, %v223_v62 }
 0x114   :  { %v244_v0 = vmul.f32 0.01, %v240_v61  ;;  %vm242_vm2 = vcmp.gt.f32.partialorder %v240_v61, 0.0 }
 0x115   :  { %vm241_vm3 = vcmp.gt.f32.partialorder %v239_v63, 0.0  ;;  %v243_v1 = vmul.f32 0.01, %v239_v63 }
 0x116   :  { %v246_v3 = vsel %vm242_vm2, %v240_v61, %v244_v0 }
 0x117   :  { %v245_v2 = vsel %vm241_vm3, %v239_v63, %v243_v1 }
 0x118   :  { %705 = vmatprep.mubr.msk.f32.mxu1 %vm262_vm4, %v245_v2 }
 0x119   :  { %706 = vmatmul.mubr.msk.f32.vlgmr.msra.gmra.mrb[0].mxu1 %vm262_vm4, %v246_v3 }
 0x11a   :  { %813 = vmatpush3.bf16.msra.mxu1 %v810_v6 }
 0x11b   :  { %815 = vmatprep.subr.bf16.mxu1 %v814_v10 }
 0x11e   :  { %817 = vmatpush3.bf16.msra.mxu1 %v814_v10 }
 0x11f   :  { %819 = vmatprep.subr.bf16.mxu1 %v818_v13 }
 0x1ec   :  { %v707_v15 = vpop.f32.mrb[0].mxu1 }
 0x1ed   :  { %v341_v16 = vadd.f32 %v707_v15, %v557_v14  ;;  %v335_v17 = vpop.f32.mrb[1].mxu1 }
 0x1ee   :  { %v336_v18 = vadd.f32 %v557_v14, %v335_v17 }
 0x1ef   :  { %v347_v19 = vmul.f32 0.01, %v341_v16  ;;  %vm345_vm5 = vcmp.gt.f32.partialorder %v341_v16, 0.0 }
 0x1f0   :  { %vm344_vm6 = vcmp.gt.f32.partialorder %v336_v18, 0.0  ;;  %v346_v22 = vmul.f32 0.01, %v336_v18 }
 0x1f1   :  { %v349_v25 = vsel %vm345_vm5, %v341_v16, %v347_v19 }
 0x1f2   :  { %v348_v23 = vsel %vm344_vm6, %v336_v18, %v346_v22 }
 0x1f3   :  { %716 = vmatprep.mubr.msk.f32.mxu1 %vm361_vm7, %v348_v23 }
 0x1f4   :  { %717 = vmatmul.mubr.msk.f32.vlgmr.msra.gmra.mrb[2].mxu1 %vm361_vm7, %v349_v25 }
 0x1f5   :  { %821 = vmatpush3.bf16.msra.mxu1 %v818_v13 }
 0x1f6   :  { %823 = vmatprep.subr.bf16.mxu1 %v822_v24 }
 0x1f9   :  { %825 = vmatpush3.bf16.msra.mxu1 %v822_v24 }
 0x1fa   :  { %827 = vmatprep.subr.bf16.mxu1 %v826_v28 }
 0x1fd   :  { %829 = vmatpush3.bf16.msra.mxu1 %v826_v28 }
 0x1fe   :  { %831 = vmatprep.subr.bf16.mxu1 %v830_v31 }
 0x201   :  { %833 = vmatpush3.bf16.msra.mxu1 %v830_v31 }
 0x2c7   :  { %v718_v33 = vpop.f32.mrb[2].mxu1 }
 0x2c8   :  { %v440_v34 = vadd.f32 %v718_v33, %v560_v32  ;;  %v434_v35 = vpop.f32.mrb[3].mxu1 }
 0x2c9   :  { %v435_v37 = vadd.f32 %v560_v32, %v434_v35 }
 0x2ca   :  { %v446_v38 = vmul.f32 0.01, %v440_v34  ;;  %vm444_vm8 = vcmp.gt.f32.partialorder %v440_v34, 0.0 }
 0x2cb   :  { %vm443_vm9 = vcmp.gt.f32.partialorder %v435_v37, 0.0  ;;  %v445_v39 = vmul.f32 0.01, %v435_v37 }
 0x2cc   :  { %v448_v41 = vsel %vm444_vm8, %v440_v34, %v446_v38 }
 0x2cd   :  { %v447_v40 = vsel %vm443_vm9, %v435_v37, %v445_v39 }
 0x2ce   :  { %735 = vmatprep.mubr.msk.f32.mxu1 %vm262_vm4, %v447_v40 }
 0x2cf   :  { %736 = vmatmul.mubr.msk.f32.vlgmr.msra.gmra.mrb[4].mxu1 %vm262_vm4, %v448_v41 }
 0x3a2   :  { %v737_v43 = vpop.f32.mrb[4].mxu1 }
 0x3a3   :  { %v542_v44 = vadd.f32 %v737_v43, %v563_v42  ;;  %v536_v45 = vpop.f32.mrb[5].mxu1 }
 0x3a4   :  { %v537_v46 = vadd.f32 %v563_v42, %v536_v45 }
 0x3a5   :  { %v546_v47 = vadd.f32 %v542_v44, %v977_v36 }
 0x3a6   :  { %v545_v48 = vadd.f32 %v537_v46, %v917_v9 }
 0x3a7   :  { %548 = vst [vmem:[%s1098_s11 + $0x8] sm:$0xff] %v546_v47 }
 0x3a8   :  { %547 = vst [vmem:[%s1098_s11] sm:$0xff] %v545_v48 }

</bundles_post_ra>
